<compile_context>
chip_gen: v5e
topology: v5e:2x2
jax: 0.10.0
libtpu: 0.0.40
codegen_flags: <defaults>
</compile_context>

<pallas_src>
from functools import partial

import jax
import jax.numpy as jnp
from jax import lax
from jax.experimental import pallas as pl
from jax.experimental.pallas import tpu as pltpu

_LANE = 128
_NEG_INF = -1e30                      # finite mask value (NaN-safe with tiling)
_VMEM_LIMIT = 48 * 1024 * 1024        # explicit scoped-VMEM limit (< v7x 64 MiB physical)
_VMEM_BUDGET = 36 * 1024 * 1024       # working-set budget for block-size selection


def _round_up(n, m):
    return ((n + m - 1) // m) * m


def head_flash_kernel(xq_ref, xkv_ref, wq_ref, wkv_ref, o_ref,
                      q_s, m_s, l_s, acc_s):
    # xq_ref : (b_blk, T,  C)  query rows of x (constant across kv axis)
    # xkv_ref: (b_blk, tk, C)  this KV tile's rows of x
    # wq_ref : (C, Hp)         Wq * C**-0.5, zero-padded to Hp lanes, bf16
    # wkv_ref: (C, 2*Hp)       [Wk | Wv], zero-padded, bf16
    # o_ref  : (b_blk, T, Hp)  lane-dense (padded) output
    # q_s    : (b_blk, T, Hp)  bf16 cached Q projection
    # m_s,l_s: (b_blk, T, 1)   f32 online-softmax running max / denominator
    # acc_s  : (b_blk, T, Hp)  f32 running numerator
    kv = pl.program_id(1)
    n_kv = pl.num_programs(1)
    b_blk, T, C = xq_ref.shape
    tk = xkv_ref.shape[1]
    Hp = o_ref.shape[-1]

    @pl.when(kv == 0)
    def _init():
        # Q projection (scale pre-folded into Wq); bf16 operands -> MXU fast path.
        q = lax.dot_general(
            xq_ref[...].astype(jnp.bfloat16), wq_ref[...],
            dimension_numbers=(((2,), (0,)), ((), ())),
            preferred_element_type=jnp.float32)                  # (b_blk, T, Hp)
        q_s[...] = q.astype(jnp.bfloat16)
        m_s[...] = jnp.full_like(m_s, _NEG_INF)
        l_s[...] = jnp.zeros_like(l_s)
        acc_s[...] = jnp.zeros_like(acc_s)

    # Fused K|V projection for this KV tile (one matmul, lane-aligned slices).
    kv_p = lax.dot_general(
        xkv_ref[...].astype(jnp.bfloat16), wkv_ref[...],
        dimension_numbers=(((2,), (0,)), ((), ())),
        preferred_element_type=jnp.float32)                      # (b_blk, tk, 2*Hp)
    k = kv_p[:, :, :Hp].astype(jnp.bfloat16)
    v = kv_p[:, :, Hp:].astype(jnp.bfloat16)

    # scores = q @ k^T, batched, contracting the (padded) head dim.
    s = lax.dot_general(
        q_s[...], k,
        dimension_numbers=(((2,), (2,)), ((0,), (0,))),
        preferred_element_type=jnp.float32)                      # (b_blk, T, tk)

    # Causal mask with global column offset kv*tk (finite mask value).
    row = lax.broadcasted_iota(jnp.int32, (T, tk), 0)
    col = lax.broadcasted_iota(jnp.int32, (T, tk), 1) + kv * tk
    s = jnp.where((row >= col)[None, :, :], s, _NEG_INF)

    # Online softmax update.
    m_prev = m_s[...]
    m_new = jnp.maximum(m_prev, jnp.max(s, axis=-1, keepdims=True))
    alpha = jnp.exp(m_prev - m_new)                              # (b_blk, T, 1)
    p = jnp.exp(s - m_new)                                       # (b_blk, T, tk)
    l_s[...] = alpha * l_s[...] + jnp.sum(p, axis=-1, keepdims=True)
    pv = lax.dot_general(
        p.astype(jnp.bfloat16), v,
        dimension_numbers=(((2,), (1,)), ((0,), (0,))),
        preferred_element_type=jnp.float32)                      # (b_blk, T, Hp)
    acc_s[...] = alpha * acc_s[...] + pv
    m_s[...] = m_new

    @pl.when(kv == n_kv - 1)
    def _finalize():
        inv_l = pl.reciprocal(l_s[...], approx=True)             # EUP slot (~1e-3 rel err)
        o_ref[...] = (acc_s[...] * inv_l).astype(o_ref.dtype)


def prepare_head_weights(w_key, w_query, w_value):
    """Pre-pack weights once (hoisted out of the per-forward path).

    Folds the PyTorch forward's C**-0.5 scale (C = embedding dim, per the
    module spec) into Wq, zero-pads each slab to a 128-lane multiple, and
    casts to bf16 so the kernel's MXU operands are bf16 (f32 accumulation).
    """
    C, H = w_query.shape
    Hp = _round_up(H, _LANE)
    pad = ((0, 0), (0, Hp - H))
    scale = C ** -0.5
    w_q = jnp.pad(w_query * scale, pad).astype(jnp.bfloat16)               # (C, Hp)
    w_kv = jnp.concatenate(
        [jnp.pad(w_key, pad), jnp.pad(w_value, pad)], axis=1
    ).astype(jnp.bfloat16)                                                  # (C, 2*Hp)
    return w_q, w_kv


def _pick_kv_tile(T):
    if T <= 1024:
        return T
    for tk in range(512, 7, -8):
        if T % tk == 0:
            return tk
    return T


def _vmem_bytes(b_blk, T, tk, C, Hp, x_itemsize):
    db = 2  # double-buffered pipeline blocks
    xq = db * b_blk * T * C * x_itemsize
    xkv = db * b_blk * tk * C * x_itemsize
    w = db * 3 * C * Hp * 2                                   # bf16 weight slabs
    out = db * b_blk * T * Hp * x_itemsize
    scratch = b_blk * T * Hp * (2 + 4) + 2 * b_blk * T * 4    # q(bf16)+acc(f32)+m,l
    live = 2 * b_blk * T * tk * 4 + b_blk * tk * 2 * Hp * 4 + b_blk * T * Hp * 4
    return xq + xkv + w + out + scratch + live


def _pick_batch_block(B, T, tk, C, Hp, x_itemsize, budget):
    # Keep >= 2 parallel grid steps whenever B allows it (both v7x TCs busy);
    # within that, largest divisor of B whose working set fits the budget.
    max_blk = B if B < 2 else max(1, B // 2)
    best = 1
    for b_blk in range(1, max_blk + 1):
        if B % b_blk:
            continue
        if _vmem_bytes(b_blk, T, tk, C, Hp, x_itemsize) <= budget:
            best = b_blk
    return best


@partial(jax.jit, static_argnames=("head_size",))
def head_forward(x, w_q_padded, w_kv_padded, head_size):
    """x: (B, T, C); padded weights from prepare_head_weights(). -> (B, T, head_size)."""
    B, T, C = x.shape
    Hp = w_q_padded.shape[1]
    tk = _pick_kv_tile(T)
    n_kv = T // tk
    b_blk = _pick_batch_block(B, T, tk, C, Hp, x.dtype.itemsize, _VMEM_BUDGET)

    out_padded = pl.pallas_call(
        head_flash_kernel,
        out_shape=jax.ShapeDtypeStruct((B, T, Hp), x.dtype),
        grid_spec=pltpu.PrefetchScalarGridSpec(
            num_scalar_prefetch=0,
            grid=(B // b_blk, n_kv),
            in_specs=[
                pl.BlockSpec((b_blk, T, C), lambda b, kv: (b, 0, 0)),    # x (query rows)
                pl.BlockSpec((b_blk, tk, C), lambda b, kv: (b, kv, 0)),  # x (KV tile rows)
                pl.BlockSpec((C, Hp), lambda b, kv: (0, 0)),             # Wq (resident)
                pl.BlockSpec((C, 2 * Hp), lambda b, kv: (0, 0)),         # [Wk|Wv] (resident)
            ],
            out_specs=pl.BlockSpec((b_blk, T, Hp), lambda b, kv: (b, 0, 0)),
            scratch_shapes=[
                pltpu.VMEM((b_blk, T, Hp), jnp.bfloat16),   # cached Q projection
                pltpu.VMEM((b_blk, T, 1), jnp.float32),     # running max m
                pltpu.VMEM((b_blk, T, 1), jnp.float32),     # running denom l
                pltpu.VMEM((b_blk, T, Hp), jnp.float32),    # running numerator acc
            ],
        ),
        compiler_params=pltpu.CompilerParams(
            dimension_semantics=("parallel", "arbitrary"),
            vmem_limit_bytes=_VMEM_LIMIT,
        ),
    )(x, x, w_q_padded, w_kv_padded)

    # Drop lane padding outside the kernel (cheap XLA slice).
    return out_padded[..., :head_size]


def reference(x, w_key, w_query, w_value):
    B, T, C = x.shape
    k = x @ w_key
    q = x @ w_query
    v = x @ w_value
    w = (q @ jnp.swapaxes(k, -2, -1)) * (C ** -0.5)
    mask = jnp.tril(jnp.ones((T, T), dtype=bool))
    w = jnp.where(mask, w, -jnp.inf)
    w = jax.nn.softmax(w, axis=-1)
    return w @ v


if __name__ == "__main__":
    # Constants (synthetic, small): embedding dims C=32, block size T=8, head_size H=16
    B, T, C, H = 2, 8, 32, 16

    key = jax.random.PRNGKey(0)
    kx, kk, kq, kv = jax.random.split(key, 4)
    x = jax.random.normal(kx, (B, T, C), dtype=jnp.float32)
    # deterministic Linear weights (no bias), stored as (C, H)
    w_key = jax.random.normal(kk, (C, H), dtype=jnp.float32) * (C ** -0.5)
    w_query = jax.random.normal(kq, (C, H), dtype=jnp.float32) * (C ** -0.5)
    w_value = jax.random.normal(kv, (C, H), dtype=jnp.float32) * (C ** -0.5)

    # Weight packing hoisted out of the per-call path (done once).
    w_q_p, w_kv_p = prepare_head_weights(w_key, w_query, w_value)

    out = head_forward(x, w_q_p, w_kv_p, H)
    out = jax.block_until_ready(out)

    ref = reference(x, w_key, w_query, w_value)
    assert out.shape == (B, T, H)
    # bf16 MXU operands + approx reciprocal -> tolerance loosened accordingly.
    assert jnp.allclose(out, ref, atol=3e-2, rtol=3e-2), "mismatch vs reference"

    print("KERNEL_OK")
</pallas_src>

<mosaic_0001>
module attributes {stable_mosaic.version = 11 : i64} {
  func.func @head_flash_kernel(%arg0: i32, %arg1: i32, %arg2: memref<1x8x32xf32, #tpu.memory_space<vmem>>, %arg3: memref<1x8x32xf32, #tpu.memory_space<vmem>>, %arg4: memref<32x128xbf16, #tpu.memory_space<vmem>>, %arg5: memref<32x256xbf16, #tpu.memory_space<vmem>>, %arg6: memref<1x8x128xf32, #tpu.memory_space<vmem>>, %arg7: memref<1x8x128xbf16, #tpu.memory_space<vmem>>, %arg8: memref<1x8x1xf32, #tpu.memory_space<vmem>>, %arg9: memref<1x8x1xf32, #tpu.memory_space<vmem>>, %arg10: memref<1x8x128xf32, #tpu.memory_space<vmem>>) attributes {dimension_semantics = [#tpu.dimension_semantics<parallel>, #tpu.dimension_semantics<arbitrary>], iteration_bounds = array<i64: 2, 1>, scalar_prefetch = 0 : i64, scratch_operands = 4 : i64, tpu.core_type = #tpu.core_type<tc>, window_params = [{transform_indices = @transform_0, window_bounds = array<i64: 1, 8, 32>}, {transform_indices = @transform_1, window_bounds = array<i64: 1, 8, 32>}, {pipeline_mode = #tpu.pipeline_mode<synchronous>, transform_indices = @transform_2, window_bounds = array<i64: 32, 128>}, {pipeline_mode = #tpu.pipeline_mode<synchronous>, transform_indices = @transform_3, window_bounds = array<i64: 32, 256>}, {transform_indices = @transform_4, window_bounds = array<i64: 1, 8, 128>}]} {
    %c0_i32 = arith.constant 0 : i32
    %0 = arith.cmpi eq, %arg1, %c0_i32 : i32
    %1 = arith.extui %0 : i1 to i32
    %c0_i32_0 = arith.constant 0 : i32
    %2 = arith.cmpi ne, %1, %c0_i32_0 : i32
    scf.if %2 {
      %c0_33 = arith.constant 0 : index
      %c0_34 = arith.constant 0 : index
      %c0_35 = arith.constant 0 : index
      %48 = vector.load %arg2[%c0_33, %c0_34, %c0_35] : memref<1x8x32xf32, #tpu.memory_space<vmem>>, vector<1x8x32xf32>
      %49 = arith.truncf %48 : vector<1x8x32xf32> to vector<1x8x32xbf16>
      %c0_36 = arith.constant 0 : index
      %c0_37 = arith.constant 0 : index
      %50 = vector.load %arg4[%c0_36, %c0_37] : memref<32x128xbf16, #tpu.memory_space<vmem>>, vector<32x128xbf16>
      %cst_38 = arith.constant dense<0.000000e+00> : vector<1x8x128xf32>
      %51 = tpu.matmul %49, %50, %cst_38 {dimension_numbers = #tpu.dot_dimension_numbers<[2], [0], [0, 1], [1], [0, 0, 0, 1, 1, 1], [], []>} : vector<1x8x32xbf16>, vector<32x128xbf16>, vector<1x8x128xf32> -> vector<1x8x128xf32>
      %52 = arith.truncf %51 : vector<1x8x128xf32> to vector<1x8x128xbf16>
      %c0_39 = arith.constant 0 : index
      %c0_40 = arith.constant 0 : index
      %c0_41 = arith.constant 0 : index
      %53 = vector.load %arg7[%c0_39, %c0_40, %c0_41] : memref<1x8x128xbf16, #tpu.memory_space<vmem>>, vector<1x8x128xbf16>
      tpu.vector_store %arg7[%c0_39, %c0_40, %c0_41], %52 {strides = array<i32>} : memref<1x8x128xbf16, #tpu.memory_space<vmem>>, vector<1x8x128xbf16>,
      %cst_42 = arith.constant -1.000000e+30 : f32
      %54 = vector.broadcast %cst_42 : f32 to vector<1x8x1xf32>
      %c0_43 = arith.constant 0 : index
      %c0_44 = arith.constant 0 : index
      %c0_45 = arith.constant 0 : index
      %55 = vector.load %arg8[%c0_43, %c0_44, %c0_45] : memref<1x8x1xf32, #tpu.memory_space<vmem>>, vector<1x8x1xf32>
      tpu.vector_store %arg8[%c0_43, %c0_44, %c0_45], %54 {strides = array<i32>} : memref<1x8x1xf32, #tpu.memory_space<vmem>>, vector<1x8x1xf32>,
      %cst_46 = arith.constant 0.000000e+00 : f32
      %56 = vector.broadcast %cst_46 : f32 to vector<1x8x1xf32>
      %c0_47 = arith.constant 0 : index
      %c0_48 = arith.constant 0 : index
      %c0_49 = arith.constant 0 : index
      %57 = vector.load %arg9[%c0_47, %c0_48, %c0_49] : memref<1x8x1xf32, #tpu.memory_space<vmem>>, vector<1x8x1xf32>
      tpu.vector_store %arg9[%c0_47, %c0_48, %c0_49], %56 {strides = array<i32>} : memref<1x8x1xf32, #tpu.memory_space<vmem>>, vector<1x8x1xf32>,
      %cst_50 = arith.constant 0.000000e+00 : f32
      %58 = vector.broadcast %cst_50 : f32 to vector<1x8x128xf32>
      %c0_51 = arith.constant 0 : index
      %c0_52 = arith.constant 0 : index
      %c0_53 = arith.constant 0 : index
      %59 = vector.load %arg10[%c0_51, %c0_52, %c0_53] : memref<1x8x128xf32, #tpu.memory_space<vmem>>, vector<1x8x128xf32>
      tpu.vector_store %arg10[%c0_51, %c0_52, %c0_53], %58 {strides = array<i32>} : memref<1x8x128xf32, #tpu.memory_space<vmem>>, vector<1x8x128xf32>,
    } else {
    }
    %c0 = arith.constant 0 : index
    %c0_1 = arith.constant 0 : index
    %c0_2 = arith.constant 0 : index
    %3 = vector.load %arg3[%c0, %c0_1, %c0_2] : memref<1x8x32xf32, #tpu.memory_space<vmem>>, vector<1x8x32xf32>
    %4 = arith.truncf %3 : vector<1x8x32xf32> to vector<1x8x32xbf16>
    %c0_3 = arith.constant 0 : index
    %c0_4 = arith.constant 0 : index
    %5 = vector.load %arg5[%c0_3, %c0_4] : memref<32x256xbf16, #tpu.memory_space<vmem>>, vector<32x256xbf16>
    %cst = arith.constant dense<0.000000e+00> : vector<1x8x256xf32>
    %6 = tpu.matmul %4, %5, %cst {dimension_numbers = #tpu.dot_dimension_numbers<[2], [0], [0, 1], [1], [0, 0, 0, 1, 1, 1], [], []>} : vector<1x8x32xbf16>, vector<32x256xbf16>, vector<1x8x256xf32> -> vector<1x8x256xf32>
    %7 = vector.extract_strided_slice %6 {offsets = [0, 0, 0], sizes = [1, 8, 128], strides = [1, 1, 1]} : vector<1x8x256xf32> to vector<1x8x128xf32>
    %8 = arith.truncf %7 : vector<1x8x128xf32> to vector<1x8x128xbf16>
    %9 = vector.extract_strided_slice %6 {offsets = [0, 0, 128], sizes = [1, 8, 128], strides = [1, 1, 1]} : vector<1x8x256xf32> to vector<1x8x128xf32>
    %10 = arith.truncf %9 : vector<1x8x128xf32> to vector<1x8x128xbf16>
    %c0_5 = arith.constant 0 : index
    %c0_6 = arith.constant 0 : index
    %c0_7 = arith.constant 0 : index
    %11 = vector.load %arg7[%c0_5, %c0_6, %c0_7] : memref<1x8x128xbf16, #tpu.memory_space<vmem>>, vector<1x8x128xbf16>
    %cst_8 = arith.constant dense<0.000000e+00> : vector<1x8x8xf32>
    %12 = tpu.matmul %11, %8, %cst_8 {dimension_numbers = #tpu.dot_dimension_numbers<[2], [2], [1], [1], [0, 0, 0, 1, 1, 1], [0], [0]>} : vector<1x8x128xbf16>, vector<1x8x128xbf16>, vector<1x8x8xf32> -> vector<1x8x8xf32>
    %13 = tpu.iota {dimensions = array<i32: 0>} : vector<8x8xi32>
    %14 = tpu.iota {dimensions = array<i32: 1>} : vector<8x8xi32>
    %c8_i32 = arith.constant 8 : i32
    %15 = arith.muli %arg1, %c8_i32 : i32
    %16 = vector.broadcast %15 : i32 to vector<8x8xi32>
    %17 = arith.addi %14, %16 : vector<8x8xi32>
    %18 = arith.cmpi sge, %13, %17 : vector<8x8xi32>
    %19 = vector.shape_cast %18 : vector<8x8xi1> to vector<1x8x8xi1>
    %cst_9 = arith.constant -1.000000e+30 : f32
    %20 = vector.broadcast %cst_9 : f32 to vector<1x8x8xf32>
    %21 = arith.select %19, %12, %20 : vector<1x8x8xi1>, vector<1x8x8xf32>
    %c0_10 = arith.constant 0 : index
    %c0_11 = arith.constant 0 : index
    %c0_12 = arith.constant 0 : index
    %22 = vector.load %arg8[%c0_10, %c0_11, %c0_12] : memref<1x8x1xf32, #tpu.memory_space<vmem>>, vector<1x8x1xf32>
    %cst_13 = arith.constant dense<0xFF800000> : vector<1x8xf32>
    %23 = vector.multi_reduction <maximumf>, %21, %cst_13 [2] : vector<1x8x8xf32> to vector<1x8xf32>
    %24 = vector.shape_cast %23 : vector<1x8xf32> to vector<1x8x1xf32>
    %25 = arith.maximumf %22, %24 : vector<1x8x1xf32>
    %26 = arith.subf %22, %25 : vector<1x8x1xf32>
    %27 = math.exp %26 : vector<1x8x1xf32>
    %28 = vector.broadcast %25 : vector<1x8x1xf32> to vector<1x8x8xf32>
    %29 = arith.subf %21, %28 : vector<1x8x8xf32>
    %30 = math.exp %29 : vector<1x8x8xf32>
    %c0_14 = arith.constant 0 : index
    %c0_15 = arith.constant 0 : index
    %c0_16 = arith.constant 0 : index
    %31 = vector.load %arg9[%c0_14, %c0_15, %c0_16] : memref<1x8x1xf32, #tpu.memory_space<vmem>>, vector<1x8x1xf32>
    %32 = arith.mulf %27, %31 : vector<1x8x1xf32>
    %cst_17 = arith.constant dense<0.000000e+00> : vector<1x8xf32>
    %33 = vector.multi_reduction <add>, %30, %cst_17 [2] : vector<1x8x8xf32> to vector<1x8xf32>
    %34 = vector.shape_cast %33 : vector<1x8xf32> to vector<1x8x1xf32>
    %35 = arith.addf %32, %34 : vector<1x8x1xf32>
    %c0_18 = arith.constant 0 : index
    %c0_19 = arith.constant 0 : index
    %c0_20 = arith.constant 0 : index
    %36 = vector.load %arg9[%c0_18, %c0_19, %c0_20] : memref<1x8x1xf32, #tpu.memory_space<vmem>>, vector<1x8x1xf32>
    tpu.vector_store %arg9[%c0_18, %c0_19, %c0_20], %35 {strides = array<i32>} : memref<1x8x1xf32, #tpu.memory_space<vmem>>, vector<1x8x1xf32>,
    %37 = arith.truncf %30 : vector<1x8x8xf32> to vector<1x8x8xbf16>
    %cst_21 = arith.constant dense<0.000000e+00> : vector<1x8x128xf32>
    %38 = tpu.matmul %37, %10, %cst_21 {dimension_numbers = #tpu.dot_dimension_numbers<[2], [1], [1], [2], [0, 0, 0, 1, 1, 2], [0], [0]>} : vector<1x8x8xbf16>, vector<1x8x128xbf16>, vector<1x8x128xf32> -> vector<1x8x128xf32>
    %c0_22 = arith.constant 0 : index
    %c0_23 = arith.constant 0 : index
    %c0_24 = arith.constant 0 : index
    %39 = vector.load %arg10[%c0_22, %c0_23, %c0_24] : memref<1x8x128xf32, #tpu.memory_space<vmem>>, vector<1x8x128xf32>
    %40 = vector.broadcast %27 : vector<1x8x1xf32> to vector<1x8x128xf32>
    %41 = arith.mulf %40, %39 : vector<1x8x128xf32>
    %42 = arith.addf %41, %38 : vector<1x8x128xf32>
    %c0_25 = arith.constant 0 : index
    %c0_26 = arith.constant 0 : index
    %c0_27 = arith.constant 0 : index
    %43 = vector.load %arg10[%c0_25, %c0_26, %c0_27] : memref<1x8x128xf32, #tpu.memory_space<vmem>>, vector<1x8x128xf32>
    tpu.vector_store %arg10[%c0_25, %c0_26, %c0_27], %42 {strides = array<i32>} : memref<1x8x128xf32, #tpu.memory_space<vmem>>, vector<1x8x128xf32>,
    %c0_28 = arith.constant 0 : index
    %c0_29 = arith.constant 0 : index
    %c0_30 = arith.constant 0 : index
    %44 = vector.load %arg8[%c0_28, %c0_29, %c0_30] : memref<1x8x1xf32, #tpu.memory_space<vmem>>, vector<1x8x1xf32>
    tpu.vector_store %arg8[%c0_28, %c0_29, %c0_30], %25 {strides = array<i32>} : memref<1x8x1xf32, #tpu.memory_space<vmem>>, vector<1x8x1xf32>,
    %c0_i32_31 = arith.constant 0 : i32
    %45 = arith.cmpi eq, %arg1, %c0_i32_31 : i32
    %46 = arith.extui %45 : i1 to i32
    %c0_i32_32 = arith.constant 0 : i32
    %47 = arith.cmpi ne, %46, %c0_i32_32 : i32
    scf.if %47 {
      %c0_33 = arith.constant 0 : index
      %c0_34 = arith.constant 0 : index
      %c0_35 = arith.constant 0 : index
      %48 = vector.load %arg9[%c0_33, %c0_34, %c0_35] : memref<1x8x1xf32, #tpu.memory_space<vmem>>, vector<1x8x1xf32>
      %49 = tpu.reciprocal %48 {approx = true} : vector<1x8x1xf32> -> vector<1x8x1xf32>
      %c0_36 = arith.constant 0 : index
      %c0_37 = arith.constant 0 : index
      %c0_38 = arith.constant 0 : index
      %50 = vector.load %arg10[%c0_36, %c0_37, %c0_38] : memref<1x8x128xf32, #tpu.memory_space<vmem>>, vector<1x8x128xf32>
      %51 = vector.broadcast %49 : vector<1x8x1xf32> to vector<1x8x128xf32>
      %52 = arith.mulf %50, %51 : vector<1x8x128xf32>
      %c0_39 = arith.constant 0 : index
      %c0_40 = arith.constant 0 : index
      %c0_41 = arith.constant 0 : index
      %53 = vector.load %arg6[%c0_39, %c0_40, %c0_41] : memref<1x8x128xf32, #tpu.memory_space<vmem>>, vector<1x8x128xf32>
      tpu.vector_store %arg6[%c0_39, %c0_40, %c0_41], %52 {strides = array<i32>} : memref<1x8x128xf32, #tpu.memory_space<vmem>>, vector<1x8x128xf32>,
    } else {
    }
    return
  }
  func.func @transform_0(%arg0: i32, %arg1: i32) -> (i32, i32, i32) {
    %c0_i32 = arith.constant 0 : i32
    %c0_i32_0 = arith.constant 0 : i32
    %c0_i32_1 = arith.constant 0 : i32
    return %arg0, %c0_i32, %c0_i32_0 : i32, i32, i32
  }
  func.func @transform_1(%arg0: i32, %arg1: i32) -> (i32, i32, i32) {
    %c0_i32 = arith.constant 0 : i32
    %c0_i32_0 = arith.constant 0 : i32
    return %arg0, %arg1, %c0_i32 : i32, i32, i32
  }
  func.func @transform_2(%arg0: i32, %arg1: i32) -> (i32, i32) {
    %c0_i32 = arith.constant 0 : i32
    %c0_i32_0 = arith.constant 0 : i32
    %c0_i32_1 = arith.constant 0 : i32
    return %c0_i32, %c0_i32_0 : i32, i32
  }
  func.func @transform_3(%arg0: i32, %arg1: i32) -> (i32, i32) {
    %c0_i32 = arith.constant 0 : i32
    %c0_i32_0 = arith.constant 0 : i32
    %c0_i32_1 = arith.constant 0 : i32
    return %c0_i32, %c0_i32_0 : i32, i32
  }
  func.func @transform_4(%arg0: i32, %arg1: i32) -> (i32, i32, i32) {
    %c0_i32 = arith.constant 0 : i32
    %c0_i32_0 = arith.constant 0 : i32
    %c0_i32_1 = arith.constant 0 : i32
    return %arg0, %c0_i32, %c0_i32_0 : i32, i32, i32
  }
}

</mosaic_0001>

<bundles_post_ra>
// kernel: head_forward.1
= control target key start
LH: loop header
LB: loop body
LE: loop exit
PB: predicated region body
PF: predicated region fallthrough
CT: control target
= control target key end

     0   :  { %s1217_s0 = inlined_call_operand.hbm [shape: f32[2,8,32], index: 0, kind: input, shape index: {}, may-alias: {0,1}]   ;;  %s1218_s1 = inlined_call_operand.hbm [shape: f32[2,8,32], index: 1, kind: input, shape index: {}, may-alias: {0,1}]   ;;  %s1219_s2 = inlined_call_operand.hbm [shape: bf16[32,128], index: 2, kind: input, shape index: {}]   ;;  %s1220_s3 = inlined_call_operand.hbm [shape: bf16[32,256], index: 3, kind: input, shape index: {}]   ;;  %s1221_s4 = inlined_call_operand.hbm [shape: f32[2,8,128], index: 4, kind: output, shape index: {}]  }
   0x1   :  { %1224 = sst [smem:[#allocation23_spill]] %s1219_s2 }
   0x2   :  { %1225 = sst [smem:[#allocation24_spill]] %s1220_s3 }
   0x3   :  { %9 = vsyncpa [#allocation7], 0 }
   0x4   :  { %11 = vsyncpa [#allocation7 + $0x1], 0 }
   0x5   :  { %12 = vsyncpa [#allocation10], 0 }
   0x6   :  { %14 = vsyncpa [#allocation10 + $0x1], 0 }
   0x7   :  { %15 = vsyncpa [#allocation13], 0 }
   0x8   :  { %16 = vsyncpa [#allocation8], 0 }
   0x9   :  { %18 = vsyncpa [#allocation8 + $0x1], 0  ;;  %s1043_s15 = smov 0   ;;  %s1045_s16 = smov 0  }
   0xa   :  { %s1047_s17 = smov 0   ;;  %s1049_s18 = smov 0  }
   0xb   :  { %s1051_s19 = smov 0   ;;  %s1053_s20 = smov 0  }
   0xc LB: > { %1226 = sst [smem:[#allocation20_spill]] %s1003_s19  ;;  %s1074_s21 = sadd.s32 4294967295, %s1007_s20   ;;  %s1007_s20 = sphi %s1053_s20, %s24_s20   ;;  %s1003_s19 = sphi %s1051_s19, %s1238_s19   ;;  %s999_s18 = sphi %s1049_s18, %s1237_s18   ;;  %s995_s17 = sphi %s1047_s17, %s1241_s17   ;;  %s991_s16 = sphi %s1045_s16, %s1240_s16   ;;  %s987_s15 = sphi %s1043_s15, %s1239_s15  }
   0xd   : > { %p637_p0 = scmp.ge.s32.totalorder %s1007_s20, 1  ;;  %p57_p1 = scmp.eq.s32.totalorder %s1074_s21, 0 }
   0xe   : > { %p163_p2 = scmp.lt.s32.totalorder %s1007_s20, 3  ;;  %s1227_s2 = sld [smem:[#allocation23_spill]] }
   0xf   : > { %s1009_s26 = smov [#allocation11]   ;;  %p640_p6 = scmp.ge.s32.totalorder %s1007_s20, 2 }
  0x10   : > { %p1082_p3 = pnand %p637_p0, %p163_p2  ;;  %s176_s27 = sshll.u32 %s1009_s26, 4  ;;  %s177_s27 = int_to_ptr.vmem [resolvable:$true] %s176_s27 }
  0x11   : > { %s1229_s3 = sld [smem:[#allocation24_spill]]  ;;  %s1010_s5 = smov 64  }
  0x12   : > { %p703_p4 = pneg %p1082_p3  ;;  %s1011_s6 = smov 4  }
  0x13   : > { %s1012_s7 = smov [#allocation12]   ;;  %s1013_s9 = smov 128  }
  0x14   : > { %s174_s24 = sshll.u32 %s1227_s2, 4  ;;  %p704_p5 = pnand %p703_p4, %p57_p1  ;;  %s175_s24 = int_to_ptr.hbm [resolvable:$true] %s174_s24 }
  0x15   : > { %s190_s8 = sshll.u32 %s1012_s7, 4  ;;  %s1014_s10 = smov 8   ;;  %s191_s8 = int_to_ptr.vmem [resolvable:$true] %s190_s8 }
  0x16   : > { %706 = dma.hbm_to_vmem [thread:$0]  (!%p704_p5), %s175_s24, 256, %s177_s27, [#allocation10], %s1010_s5, %s1010_s5, %s1011_s6  }
  0x17   : > { %s188_s30 = sshll.u32 %s1229_s3, 4  ;;  %s636_s11 = sadd.s32 4294967294, %s1007_s20   ;;  %s189_s30 = int_to_ptr.hbm [resolvable:$true] %s188_s30 }
  0x18   : > { %709 = dma.hbm_to_vmem [thread:$0]  (!%p704_p5), %s189_s30, 512, %s191_s8, [#allocation13], %s1013_s9, %s1013_s9, %s1014_s10  }
  0x19   : > { %s36_s12 = sadd.s32 1, %s1003_s19  ;;  %s43_s13 = sadd.s32 1, %s995_s17 }
  0x1a   : > { %p38_p7 = scmp.ge.s32.totalorder %s36_s12, 2  ;;  %p50_p8 = scmp.ne.s32.totalorder %s995_s17, %s991_s16 }
  0x1b   : > { %p51_p9 = scmp.eq.s32.totalorder %s1007_s20, 0  ;;  %p56_p11 = scmp.ne.s32.totalorder %s991_s16, %s987_s15 }
  0x1c   : > { %s1243_s12 = smov (%p38_p7, %s36_s12), 0  ;;  %p150_p12 = scmp.eq.s32.totalorder %s1074_s21, 1 }
  0x1d   : > { %1230 = sst [smem:[#allocation21_spill]] %s1243_s12  ;;  %p1102_p10 = por %p51_p9, %p50_p8 }
  0x1e   : > { %s40_s22 = ssub.s32 %s1003_s19, %s1243_s12  ;;  %p1113_p0 = por %p57_p1, %p56_p11 }
  0x1f   : > { %p41_p13 = scmp.eq.s32.totalorder %s40_s22, 0  ;;  %p1117_p2 = por %p150_p12, %p50_p8 }
  0x20   : > { %p156_p4 = scmp.eq.s32.totalorder %s636_s11, 1  ;;  %p723_p7 = scmp.lt.s32.totalorder %s1007_s20, 2 }
  0x21   : > { %s1122_s26 = scalar_select %p41_p13, %s995_s17, %s43_s13  }
  0x22   : > { %p1124_p5 = por %p156_p4, %p56_p11  ;;  %s204_s28 = sand.u32 1, %s995_s17  }
  0x23   : > { %1234 = sst [smem:[#allocation22_spill]] %s1122_s26  ;;  %s642_s29 = sshll.u32 %s1003_s19, 3 }
  0x24   : > { %s641_s30 = sshll.u32 %s204_s28, 3  ;;  %s212_s7 = scalar_lea.hbm %s1217_s0, %s642_s29 }
  0x25   : > { %s214_s8 = sshll.u32 %s212_s7, 4  ;;  %s208_s9 = scalar_lea.vmem [#allocation6], %s641_s30  ;;  %s215_s8 = int_to_ptr.hbm [resolvable:$true] %s214_s8 }
  0x26   : > { %s216_s10 = sshll.u32 %s208_s9, 4  ;;  %p711_p8 = pnand %p723_p7, %p1102_p10  ;;  %s217_s10 = int_to_ptr.vmem [resolvable:$true] %s216_s10 }
  0x27   : > { %s232_s22 = scalar_lea.hbm %s1218_s1, %s642_s29  ;;  %s223_s2 = sand.u32 1, %s1007_s20  }
  0x28   : > { %s205_s3 = scalar_lea.sflag [#allocation7], %s204_s28  ;;  %s234_s12 = sshll.u32 %s232_s22, 4  ;;  %s235_s12 = int_to_ptr.hbm [resolvable:$true] %s234_s12 }
  0x29   : > { %713 = dma.hbm_to_vmem [thread:$0]  (!%p711_p8), %s215_s8, 128, %s217_s10, %s205_s3  }
  0x2a   : > { %s227_s19 = scalar_lea.vmem [#allocation9], %s641_s30  ;;  %s224_s5 = scalar_lea.sflag [#allocation10], %s223_s2 }
  0x2b   : > { %s236_s26 = sshll.u32 %s227_s19, 4  ;;  %245 = sbr.rel (%p1082_p3) target bundleno = 810 (0x32a), region = 36  ;;  %s237_s26 = int_to_ptr.vmem [resolvable:$true] %s236_s26 }
  0x2c   : > { %716 = dma.hbm_to_vmem [thread:$0]  (!%p711_p8), %s235_s12, 128, %s237_s26, %s224_s5  }
  0x2d   : > { %s1143_s14 = sand.u32 (!%p1082_p3), 1, %s991_s16  }
  0x2e   : > { %s1146_s29 = sshll.u32 (!%p1082_p3), %s1143_s14, 3  ;;  %s248_s3 = scalar_lea.sflag (!%p1082_p3), [#allocation7], %s1143_s14 }
  0x2f   : > { %s251_s28 = scalar_lea.vmem (!%p1082_p3), [#allocation6], %s1146_s29 }
  0x30   : > { %966 = dma.done.wait (%p1113_p0), %s248_s3, 128  }
  0x31   : > { %968 = vsyncadd (%p1113_p0), %s248_s3, 4294967168  ;;  %s257_s2 = sand.u32 1, %s1074_s21   ;;  %s261_s25 = scalar_lea.vmem [#allocation9], %s1146_s29 }
  0x32   : > { %s258_s19 = scalar_lea.sflag [#allocation10], %s257_s2 }
  0x33   : > { %970 = dma.done.wait (%p1113_p0), %s258_s19, 128  }
  0x34   : > { %972 = vsyncadd (%p1113_p0), %s258_s19, 4294967168 }
  0x35   : > { %974 = dma.done.wait (%p57_p1), [#allocation10], 256  }
  0x36   : > { %976 = vsyncadd (%p57_p1), [#allocation10], 4294967040 }
  0x37   : > { %978 = dma.done.wait (%p57_p1), [#allocation13], 512  }
  0x38   : > { %980 = vsyncadd (%p57_p1), [#allocation13], 4294966784  ;;  %v684_v0 = vld [vmem:[#allocation11 + $0x8] sm:$0xff]  ;;  %v670_v1 = vld [vmem:[#allocation12 + $0x10] sm:$0xf]  ;;  %vm325_vm0 = vcmask 261120   ;;  %v420_v26 = vlaneseq }
  0x39   : > { %v688_v2 = vld [vmem:[#allocation12 + $0x14] sm:$0xf0]  ;;  %v662_v4 = vld [vmem:[#allocation12] sm:$0xf]  ;;  %v686_v5 = vld [vmem:[#allocation12 + $0x4] sm:$0xf0]  ;;  %335 = vmatpush.bf16.msra.mxu0 %v684_v0 }
  0x3a   : > { %v671_v3 = vor.u32 %v688_v2, %v670_v1  ;;  %v683_v6 = vld [vmem:[#allocation11] sm:$0xff]  ;;  %v663_v8 = vor.u32 %v686_v5, %v662_v4  ;;  %v348_v9 = vld [vmem:[%s261_s25] sm:$0xff]  ;;  %v672_v20 = vld [vmem:[#allocation12 + $0x18] sm:$0xf0]  ;;  %vm344_vm1 = vcmask 7168   ;;  %v421_v27 = vshrl.u32 %v420_v26, 7 }
  0x3b   : > { %v307_v7 = vld [vmem:[%s251_s28] sm:$0xff]  ;;  %v349_v11 = vpack.c.bf16 %v348_v9, %v348_v9  ;;  %v685_v21 = vld [vmem:[#allocation12 + $0x4] sm:$0xf]  ;;  %v664_v23 = vld [vmem:[#allocation12 + $0x8] sm:$0xf0]  ;;  %v423_v28 = vand.u32 127, %v420_v26 }
  0x3c   : > { %384 = vmatpush.bf16.msra.mxu1 %v671_v3  ;;  %v308_v10 = vpack.c.bf16 %v307_v7, %v307_v7  ;;  %v687_v19 = vld [vmem:[#allocation12 + $0x14] sm:$0xf]  ;;  %v1015_v24 = vmov -1e+30   ;;  %v667_v25 = vor.u32 %v685_v21, %v664_v23  ;;  %vm430_vm3 = vcmask 64512   ;;  %s680_s21 = sshll.u32 %s999_s18, 3 }
  0x3d   : > { %336 = vmatpush.bf16.msra.mxu0 %v683_v6  ;;  %v675_v22 = vor.u32 %v687_v19, %v672_v20  ;;  %345 = vst.msk [vmem:[#allocation3] sm:$0xff] %vm344_vm1, %v1015_v24  ;;  %vm427_vm2 = vcmp.ge.s32.totalorder %v421_v27, %v423_v28  ;;  %v1016_v33 = vmov 0   ;;  %v1017_v34 = vmov 0.0   ;;  %s509_s26 = scalar_lea.hbm %s1221_s4, %s680_s21  ;;  %s301_s30 = scalar_lea.vmem [#allocation14], %s1146_s29 }
  0x3e   : > { %784 = vset.pattern.permute.xlu0 %v1016_v33  ;;  %785 = vset.pattern.permute.xlu1 %v1016_v33  ;;  %346 = vst.msk [vmem:[#allocation4] sm:$0xff] %vm344_vm1, %v1017_v34  ;;  %vm458_vm4 = vcmask 1043456   ;;  %s511_s6 = sshll.u32 %s301_s30, 4  ;;  %s513_s7 = sshll.u32 %s509_s26, 4  ;;  %s512_s6 = int_to_ptr.vmem [resolvable:$true] %s511_s6  ;;  %s514_s7 = int_to_ptr.hbm [resolvable:$true] %s513_s7 }
  0x3f   : > { %397 = vmatpush.bf16.msra.mxu2 %v675_v22  ;;  %786 = vset.pattern.permute.xlu2 %v1016_v33  ;;  %s499_s8 = scalar_lea.sflag [#allocation8], %s1143_s14  ;;  %s927_s9 = sshra.s32 %s514_s7, 4  ;;  %s928_s9 = int_to_ptr.hbm [resolvable:$true] %s927_s9 }
  0x40   : > { %385 = vmatpush.bf16.msra.mxu1 %v663_v8  ;;  %659 = vmatmul.msk.bf16.vlgmr.msra.gmra.mxu0 %vm325_vm0, %v308_v10  ;;  %s929_s10 = scalar_lea.hbm %s928_s9, 8  ;;  %s933_s13 = scalar_lea.hbm %s1221_s4, 16 }
  0x41   : > { %p930_p1 = scmp.ne.s32.totalorder %s928_s9, %s929_s10  ;;  %p934_p10 = scmp.lt.s32.totalorder %s928_s9, %s1221_s4 }
  0x42   : > { %p935_p11 = scmp.lt.s32.totalorder %s933_s13, %s929_s10 }
  0x43   : > { %676 = vmatmul.msk.bf16.vlgmr.msra.gmra.mxu1 %vm325_vm0, %v349_v11  ;;  %398 = vmatpush.bf16.msra.mxu2 %v667_v25  ;;  %p931_p3 = pnand %p930_p1, %p1117_p2 }
  0x44   : > { %v429_v35 = vld [vmem:[#allocation3] sm:$0xff]  ;;  %p936_p12 = por %p935_p11, %p934_p10 }
  0x45   : > { %v446_v51 = vld [vmem:[#allocation4] sm:$0xff]  ;;  %p932_p9 = pneg %p931_p3 }
  0x46   : > { %677 = vmatmul.msk.bf16.vlgmr.msra.gmra.mxu2 %vm325_vm0, %v349_v11 }
  0x47   : > { %p937_p13 = pnand %p936_p12, %p932_p9 }
  0xbd   : > { %v338_v12 = vpop.f32.mrf.mxu0 }
  0xbe   : > { %v342_v13 = vpack.c.bf16 %v338_v12, %v338_v12 }
  0xc0   : > { %v387_v14 = vpop.f32.mrf.mxu1  ;;  %343 = vst [vmem:[#allocation2] sm:$0xf] %v342_v13 }
  0xc1   : > { %v404_v15 = vpack.c.bf16 %v387_v14, %v387_v14 }
  0xc3   : > { %414 = vmatpush.bf16.xpose.msra.mxu3 %v404_v15 }
  0xc5   : > { %v340_v16 = vpop.f32.mrf.mxu0 }
  0xc7   : > { %v406_v18 = vld [vmem:[#allocation2] sm:$0xf] }
  0xc8   : > { %v389_v17 = vpop.f32.mrf.mxu1 }
  0xc9   : > { %v400_v39 = vpop.f32.mrf.mxu2 }
  0xca   : > { %415 = vmatmul.bf16.vlgmr.msra.gmra.mxu3 %v406_v18  ;;  %v405_v40 = vpack.c.bf16 %v400_v39, %v400_v39 }
  0xcc   : > { %v460_v41 = vsel %vm458_vm4, %v405_v40, 0 }
  0xcd   : > { %469 = vmatpush.bf16.msrb.mxu0 %v460_v41 }
  0xd1   : > { %v402_v42 = vpop.f32.mrf.mxu2 }
 0x14d   : > { %v416_v29 = vpop.f32.mrf.mxu3 }
 0x14e   : > { %v428_v30 = vsel %vm427_vm2, %v416_v29, -1e+30 }
 0x14f   : > { %v431_v31 = vsel %vm430_vm3, %v428_v30, -inf }
 0x150   : > { %432 = vmax.xlane.f32.xlu0 %v431_v31 }
 0x155   : > { %v418_v32 = vpop.f32.mrf.mxu3 }
 0x1c3   : > { %v433_v36 = vpop.xlane.xlu0 %432 }
 0x1c4   : > { %v434_v37 = vmax.f32 %v429_v35, %v433_v36 }
 0x1c6   : > { %v435_v38 = vsub.f32 %v429_v35, %v434_v37  ;;  %484 = vst.msk [vmem:[#allocation3] sm:$0xff] %vm344_vm1, %v434_v37  ;;  %440 = vperm.xlu0 %784, %v434_v37  }
 0x1c8   : > { %v436_v49 = vmul.f32 1.442695, %v435_v38 }
 0x238   : > { %v441_v43 = vpop.permute.xlu0 %440 }
 0x239   : > { %v443_v44 = vsub.f32 %v428_v30, %v441_v43 }
 0x23b   : > { %v444_v45 = vmul.f32 1.442695, %v443_v44 }
 0x23d   : > { %787 = vpow2.f32 %v444_v45 }
 0x23e   : > { %789 = vpow2.f32 %v436_v49 }
 0x243   : > { %v788_v46 = vpop.eup %787 }
 0x244   : > { %v448_v47 = vsel %vm430_vm3, %v788_v46, 0.0  ;;  %v454_v48 = vpack.c.bf16 %v788_v46, %v788_v46  ;;  %v790_v50 = vpop.eup %789 }
 0x245   : > { %449 = vadd.xlane.f32.xlu1 %v448_v47  ;;  %v447_v52 = vmul.f32 %v790_v50, %v446_v51 }
 0x246   : > { %678 = vmatmul.msk.bf16.vlgmr.msrb.gmra.mxu0 %vm430_vm3, %v454_v48 }
 0x25e   : > { %478 = vperm.xlu1 %785, %v790_v50  }
 0x2b8   : > { %v450_v53 = vpop.xlane.xlu1 %449 }
 0x2b9   : > { %v451_v54 = vadd.f32 %v450_v53, %v447_v52 }
 0x2bb   : > { %453 = vst.msk [vmem:[#allocation4] sm:$0xff] %vm344_vm1, %v451_v54 }
 0x2c2   : > { %v488_v55 = vld [vmem:[#allocation4] sm:$0xff] }
 0x2c3   : > { %v471_v56 = vpop.f32.mrf.mxu0  ;;  %791 = vrcp.f32 %v488_v55 }
 0x2c9   : > { %v792_v57 = vpop.eup %791 }
 0x2ca   : > { %493 = vperm.xlu2 %786, %v792_v57  }
 0x2cb   : > { %v473_v58 = vpop.f32.mrf.mxu0 }
 0x2d0   : > { %v479_v59 = vpop.permute.xlu1 %478 }
 0x2d1   : > { %v481_v60 = vmul.f32 0.0, %v479_v59 }
 0x2d3   : > { %v482_v61 = vadd.f32 %v481_v60, %v471_v56 }
 0x324   : > { %v494_v62 = vpop.permute.xlu2 %493 }
 0x325   : > { %v496_v63 = vmul.f32 %v494_v62, %v482_v61 }
 0x327   : > { %497 = vst [vmem:[%s301_s30] sm:$0xff] %v496_v63 }
 0x328   : > { %940 = shalt.err (!%p937_p13)
}
 0x329   : > { %701 = dma.vmem_to_hbm [thread:$0]  (%p1117_p2), %s512_s6, 128, %s514_s7, %s499_s8  }
 0x32a PF: > { %s525_s14 = sand.u32 1, %s987_s15   ;;  %p718_p0 = pnand %p640_p6, %p1124_p5 }
 0x32b   : > { %s526_s29 = scalar_lea.sflag [#allocation8], %s525_s14 }
 0x32c   : > { %p719_p4 = pneg %p718_p0 }
 0x32e   : > { %982 = dma.done.wait (%p719_p4), %s526_s29, 128  }
 0x32f   : > { %984 = vsyncadd (%p719_p4), %s526_s29, 4294967168  ;;  %s24_s20 = sadd.s32 1, %s1007_s20   ;;  %s1236_s3 = sld [smem:[#allocation22_spill]] }
 0x330   : > { %p21_p7 = scmp.ge.s32.totalorder %s24_s20, 4   ;;  %s1237_s18 = sld [smem:[#allocation20_spill]] }
 0x331   : > { %s1238_s19 = sld [smem:[#allocation21_spill]]  ;;  %s1239_s15 = smov %s991_s16 }
 0x332   : > { %s1240_s16 = smov %s995_s17  ;;  %23 = sbr.rel (!%p21_p7) target bundleno = 12 (0xc), region = 110 }
 0x335   : > { %s1241_s17 = smov %s1236_s3 }
 0x337   :  { %532 = vsyncpa [#allocation7], 1 }
 0x338   :  { %534 = vsyncpa [#allocation7 + $0x1], 1 }
 0x339   :  { %535 = vsyncpa [#allocation10], 1 }
 0x33a   :  { %537 = vsyncpa [#allocation10 + $0x1], 1 }
 0x33b   :  { %538 = vsyncpa [#allocation13], 1 }
 0x33c   :  { %539 = vsyncpa [#allocation8], 1 }
 0x33d   :  { %541 = vsyncpa [#allocation8 + $0x1], 1 }

</bundles_post_ra>
